<compile_context>
chip_gen: v7x
topology: tpu7x:2x2x1
jax: 0.10.0
libtpu: 0.0.40
codegen_flags: <defaults>
</compile_context>

<pallas_src>
import functools

import jax
import jax.numpy as jnp
from jax.experimental import pallas as pl
from jax.experimental.pallas import tpu as pltpu

HIDDEN = 128                          # hidden width (fixed by the PyTorch module)
SUBLANE = 8                           # f32 sublane count
DEFAULT_TB = 4096                     # big batch tile: amortizes per-grid-step overhead
TILE_VMEM_BUDGET = 24 * 1024 * 1024   # budget for double-buffered x/out tiles
VMEM_LIMIT_BYTES = 48 * 1024 * 1024   # explicit scoped-VMEM limit (<= v7x 64 MiB/TC)


def _round_up(x, m):
    return (x + m - 1) // m * m


def _mlp_kernel(x_ref, w1_ref, b1_ref, w2_ref, b2_ref, o_ref):
    # One batch tile per grid step:  out = relu(x @ W1 + b1) @ W2 + b2
    h = jnp.dot(x_ref[...], w1_ref[...], preferred_element_type=jnp.float32)
    h = jnp.maximum(h + b1_ref[...], 0.0)          # bias + ReLU in f32
    h = h.astype(w2_ref.dtype)                     # MXU input dtype for 2nd matmul
    y = jnp.dot(h, w2_ref[...], preferred_element_type=jnp.float32)
    o_ref[...] = (y + b2_ref[...]).astype(o_ref.dtype)   # true-C output block


def _choose_tb(B, D, C, in_bytes, out_bytes, block_b):
    """Pick the batch tile: as large as possible under the VMEM budget,
    but with >= 2 grid steps on moderate/large batches (megacore)."""
    # Sublane granularity: 8 rows for f32, 16 for bf16, 32 for int8 (packing).
    gran = SUBLANE * max(1, 4 // max(in_bytes, 1))
    tb = DEFAULT_TB if block_b is None else int(block_b)
    # Cap so the double-buffered x and out blocks stay within the tile budget.
    row_bytes = 2 * (D * in_bytes + C * out_bytes)
    tb = min(tb, max(gran, TILE_VMEM_BUDGET // max(row_bytes, 1)))
    # Ensure >= 2 grid steps on larger batches so both TCs on v7x get work.
    if B >= 1024:
        tb = min(tb, _round_up(pl.cdiv(B, 2), gran))
    # Never allocate blocks (much) bigger than the batch itself.
    tb = min(tb, _round_up(B, gran))
    return max(gran, (tb // gran) * gran)


@functools.partial(jax.jit, static_argnames=("block_b",))
def mlp_forward(x, w1, b1, w2, b2, *, block_b=None):
    """Forward pass of the MLP.

    x : (B, D);  w1: (D, 128);  b1: (128,);  w2: (128, C);  b2: (C,)
    Returns (B, C) in x's dtype.
    """
    B, D = x.shape
    C = w2.shape[1]
    out_dtype = x.dtype
    compute_dtype = x.dtype

    # Weights/biases are tiny and VMEM-resident: cast weights to the compute
    # dtype (no-op for f32); keep biases in f32 for exact bias + ReLU math.
    w1c = w1.astype(compute_dtype)
    w2c = w2.astype(compute_dtype)
    b1_2d = b1.reshape(1, HIDDEN).astype(jnp.float32)
    b2_2d = b2.reshape(1, C).astype(jnp.float32)

    in_bytes = jnp.dtype(compute_dtype).itemsize
    out_bytes = jnp.dtype(out_dtype).itemsize
    TB = _choose_tb(B, D, C, in_bytes, out_bytes, block_b)
    grid = (pl.cdiv(B, TB),)

    flops = 2 * B * (D * HIDDEN + HIDDEN * C)
    bytes_accessed = (
        B * D * in_bytes                          # x read (no wrapper pad/copy)
        + (w1c.size + w2c.size) * in_bytes        # weights, read once (VMEM-resident)
        + (b1_2d.size + b2_2d.size) * 4
        + B * C * out_bytes                       # true-C output, no lane padding
    )

    return pl.pallas_call(
        _mlp_kernel,
        out_shape=jax.ShapeDtypeStruct((B, C), out_dtype),
        grid_spec=pltpu.PrefetchScalarGridSpec(
            num_scalar_prefetch=0,
            grid=grid,
            in_specs=[
                # Batch-tiled activations; full-extent last dim (no D padding).
                pl.BlockSpec((TB, D), lambda i: (i, 0)),
                # Weights / biases: constant index map -> VMEM-resident across steps.
                pl.BlockSpec((D, HIDDEN), lambda i: (0, 0)),
                pl.BlockSpec((1, HIDDEN), lambda i: (0, 0)),
                pl.BlockSpec((HIDDEN, C), lambda i: (0, 0)),
                pl.BlockSpec((1, C), lambda i: (0, 0)),
            ],
            # True-C output block (full-extent last dim): no padded writeback.
            out_specs=pl.BlockSpec((TB, C), lambda i: (i, 0)),
        ),
        compiler_params=pltpu.CompilerParams(
            dimension_semantics=("parallel",),
            vmem_limit_bytes=VMEM_LIMIT_BYTES,
        ),
        cost_estimate=pl.CostEstimate(
            flops=flops, transcendentals=0, bytes_accessed=bytes_accessed),
    )(x, w1c, b1_2d, w2c, b2_2d)


def init_mlp_params(key, input_dim, num_classes):
    """Deterministic init mimicking PyTorch nn.Linear default U(-1/sqrt(fan_in), 1/sqrt(fan_in))."""
    k1, k2, k3, k4 = jax.random.split(key, 4)
    bound1 = 1.0 / jnp.sqrt(input_dim)
    bound2 = 1.0 / jnp.sqrt(HIDDEN)
    w1 = jax.random.uniform(k1, (input_dim, HIDDEN), jnp.float32, -bound1, bound1)
    b1 = jax.random.uniform(k2, (HIDDEN,), jnp.float32, -bound1, bound1)
    w2 = jax.random.uniform(k3, (HIDDEN, num_classes), jnp.float32, -bound2, bound2)
    b2 = jax.random.uniform(k4, (num_classes,), jnp.float32, -bound2, bound2)
    return w1, b1, w2, b2


def _reference(x, w1, b1, w2, b2):
    return jnp.maximum(x @ w1 + b1, 0.0) @ w2 + b2


if __name__ == "__main__":
    key = jax.random.PRNGKey(0)
    kx, kp, kx2 = jax.random.split(key, 3)

    input_dim, num_classes = 32, 10
    w1, b1, w2, b2 = init_mlp_params(kp, input_dim, num_classes)

    # --- small check (single grid step) -------------------------------------
    batch = 64
    x = jax.random.normal(kx, (batch, input_dim), jnp.float32)
    out = mlp_forward(x, w1, b1, w2, b2)
    jax.block_until_ready(out)
    ref = _reference(x, w1, b1, w2, b2)
    assert out.shape == (batch, num_classes)
    assert jnp.allclose(out, ref, atol=1e-4, rtol=1e-4), "small-batch mismatch"

    # --- larger check: 2-step grid + ragged final block (B not multiple of TB)
    batch2 = 2500
    x2 = jax.random.normal(kx2, (batch2, input_dim), jnp.float32)
    out2 = mlp_forward(x2, w1, b1, w2, b2)
    jax.block_until_ready(out2)
    ref2 = _reference(x2, w1, b1, w2, b2)
    assert out2.shape == (batch2, num_classes)
    assert jnp.allclose(out2, ref2, atol=1e-4, rtol=1e-4), "tiled-batch mismatch"

    print("KERNEL_OK")
</pallas_src>

<mosaic_0001>
module attributes {stable_mosaic.version = 11 : i64} {
  func.func @_mlp_kernel(%arg0: i32, %arg1: memref<64x32xf32, #tpu.memory_space<vmem>>, %arg2: memref<32x128xf32, #tpu.memory_space<vmem>>, %arg3: memref<1x128xf32, #tpu.memory_space<vmem>>, %arg4: memref<128x10xf32, #tpu.memory_space<vmem>>, %arg5: memref<1x10xf32, #tpu.memory_space<vmem>>, %arg6: memref<64x10xf32, #tpu.memory_space<vmem>>) attributes {dimension_semantics = [#tpu.dimension_semantics<parallel>], iteration_bounds = array<i64: 1>, scalar_prefetch = 0 : i64, scratch_operands = 0 : i64, tpu.core_type = #tpu.core_type<tc>, window_params = [{transform_indices = @transform_0, window_bounds = array<i64: 64, 32>}, {pipeline_mode = #tpu.pipeline_mode<synchronous>, transform_indices = @transform_1, window_bounds = array<i64: 32, 128>}, {pipeline_mode = #tpu.pipeline_mode<synchronous>, transform_indices = @transform_2, window_bounds = array<i64: 1, 128>}, {pipeline_mode = #tpu.pipeline_mode<synchronous>, transform_indices = @transform_3, window_bounds = array<i64: 128, 10>}, {pipeline_mode = #tpu.pipeline_mode<synchronous>, transform_indices = @transform_4, window_bounds = array<i64: 1, 10>}, {transform_indices = @transform_5, window_bounds = array<i64: 64, 10>}]} {
    %c0 = arith.constant 0 : index
    %c0_0 = arith.constant 0 : index
    %0 = vector.load %arg1[%c0, %c0_0] : memref<64x32xf32, #tpu.memory_space<vmem>>, vector<64x32xf32>
    %c0_1 = arith.constant 0 : index
    %c0_2 = arith.constant 0 : index
    %1 = vector.load %arg2[%c0_1, %c0_2] : memref<32x128xf32, #tpu.memory_space<vmem>>, vector<32x128xf32>
    %cst = arith.constant dense<0.000000e+00> : vector<64x128xf32>
    %2 = tpu.matmul %0, %1, %cst {dimension_numbers = #tpu.dot_dimension_numbers<[1], [0], [0], [1], [0, 0, 1, 1], [], []>} : vector<64x32xf32>, vector<32x128xf32>, vector<64x128xf32> -> vector<64x128xf32>
    %c0_3 = arith.constant 0 : index
    %c0_4 = arith.constant 0 : index
    %3 = vector.load %arg3[%c0_3, %c0_4] : memref<1x128xf32, #tpu.memory_space<vmem>>, vector<1x128xf32>
    %4 = vector.broadcast %3 : vector<1x128xf32> to vector<64x128xf32>
    %5 = arith.addf %2, %4 : vector<64x128xf32>
    %cst_5 = arith.constant 0.000000e+00 : f32
    %6 = vector.broadcast %cst_5 : f32 to vector<64x128xf32>
    %7 = arith.maximumf %5, %6 : vector<64x128xf32>
    %c0_6 = arith.constant 0 : index
    %c0_7 = arith.constant 0 : index
    %8 = vector.load %arg4[%c0_6, %c0_7] : memref<128x10xf32, #tpu.memory_space<vmem>>, vector<128x10xf32>
    %cst_8 = arith.constant dense<0.000000e+00> : vector<64x10xf32>
    %9 = tpu.matmul %7, %8, %cst_8 {dimension_numbers = #tpu.dot_dimension_numbers<[1], [0], [0], [1], [0, 0, 1, 1], [], []>} : vector<64x128xf32>, vector<128x10xf32>, vector<64x10xf32> -> vector<64x10xf32>
    %c0_9 = arith.constant 0 : index
    %c0_10 = arith.constant 0 : index
    %10 = vector.load %arg5[%c0_9, %c0_10] : memref<1x10xf32, #tpu.memory_space<vmem>>, vector<1x10xf32>
    %11 = vector.broadcast %10 : vector<1x10xf32> to vector<64x10xf32>
    %12 = arith.addf %9, %11 : vector<64x10xf32>
    %c0_11 = arith.constant 0 : index
    %c0_12 = arith.constant 0 : index
    %13 = vector.load %arg6[%c0_11, %c0_12] : memref<64x10xf32, #tpu.memory_space<vmem>>, vector<64x10xf32>
    tpu.vector_store %arg6[%c0_11, %c0_12], %12 {strides = array<i32>} : memref<64x10xf32, #tpu.memory_space<vmem>>, vector<64x10xf32>,
    return
  }
  func.func @transform_0(%arg0: i32) -> (i32, i32) {
    %c0_i32 = arith.constant 0 : i32
    %c0_i32_0 = arith.constant 0 : i32
    return %arg0, %c0_i32 : i32, i32
  }
  func.func @transform_1(%arg0: i32) -> (i32, i32) {
    %c0_i32 = arith.constant 0 : i32
    %c0_i32_0 = arith.constant 0 : i32
    %c0_i32_1 = arith.constant 0 : i32
    return %c0_i32, %c0_i32_0 : i32, i32
  }
  func.func @transform_2(%arg0: i32) -> (i32, i32) {
    %c0_i32 = arith.constant 0 : i32
    %c0_i32_0 = arith.constant 0 : i32
    %c0_i32_1 = arith.constant 0 : i32
    return %c0_i32, %c0_i32_0 : i32, i32
  }
  func.func @transform_3(%arg0: i32) -> (i32, i32) {
    %c0_i32 = arith.constant 0 : i32
    %c0_i32_0 = arith.constant 0 : i32
    %c0_i32_1 = arith.constant 0 : i32
    return %c0_i32, %c0_i32_0 : i32, i32
  }
  func.func @transform_4(%arg0: i32) -> (i32, i32) {
    %c0_i32 = arith.constant 0 : i32
    %c0_i32_0 = arith.constant 0 : i32
    %c0_i32_1 = arith.constant 0 : i32
    return %c0_i32, %c0_i32_0 : i32, i32
  }
  func.func @transform_5(%arg0: i32) -> (i32, i32) {
    %c0_i32 = arith.constant 0 : i32
    %c0_i32_0 = arith.constant 0 : i32
    return %arg0, %c0_i32 : i32, i32
  }
}

</mosaic_0001>

<bundles_post_ra>
// kernel: mlp_forward.1
= control target key start
LH: loop header
LB: loop body
LE: loop exit
PB: predicated region body
PF: predicated region fallthrough
CT: control target
= control target key end

     0   :  { %vm39_vm0 = vcmask 261120   ;;  %vm305_vm1 = vcmask 80896   ;;  %s644_s1 = inlined_call_operand.vmem [shape: f32[32,128], index: 1, kind: input, shape index: {}]   ;;  %s645_s0 = inlined_call_operand.vmem [shape: f32[64,32], index: 0, kind: input, shape index: {}]   ;;  %s646_s3 = inlined_call_operand.vmem [shape: f32[128,10], index: 3, kind: input, shape index: {}]   ;;  %s647_s2 = inlined_call_operand.vmem [shape: f32[1,128], index: 2, kind: input, shape index: {}]   ;;  %s648_s4 = inlined_call_operand.vmem [shape: f32[1,10], index: 4, kind: input, shape index: {}]   ;;  %s649_s5 = inlined_call_operand.vmem [shape: f32[64,10], index: 5, kind: output, shape index: {}]  }
   0x1   :  { %v28_v0 = vld [vmem:[%s644_s1] sm:$0xff]  ;;  %v29_v1 = vld [vmem:[%s644_s1 + $0x8] sm:$0xff]  ;;  %v30_v2 = vld [vmem:[%s644_s1 + $0x10] sm:$0xff] }
   0x2   :  { %v428_v3 = vpack.c.bf16 %v29_v1, %v28_v0  ;;  %v31_v4 = vld [vmem:[%s644_s1 + $0x18] sm:$0xff]  ;;  %v20_v5 = vld [vmem:[%s645_s0] sm:$0xff]  ;;  %v178_v8 = vld [vmem:[%s646_s3 + $0x8] sm:$0xff] }
   0x3   :  { %v432_v6 = vpack.c.bf16 %v31_v4, %v30_v2  ;;  %372 = vmatprep.mubr.msk.f32.mxu0 %vm39_vm0, %v20_v5  ;;  %v177_v7 = vld [vmem:[%s646_s3] sm:$0xff]  ;;  %v179_v9 = vld [vmem:[%s646_s3 + $0x10] sm:$0xff]  ;;  %v180_v11 = vld [vmem:[%s646_s3 + $0x18] sm:$0xff] }
   0x4   :  { %429 = vmatprep.subr.bf16.mxu0 %v428_v3  ;;  %v436_v10 = vpack.c.bf16 %v178_v8, %v177_v7  ;;  %v440_v12 = vpack.c.bf16 %v180_v11, %v179_v9  ;;  %v21_v13 = vld [vmem:[%s645_s0 + $0x8] sm:$0xff]  ;;  %v22_v14 = vld [vmem:[%s645_s0 + $0x10] sm:$0xff]  ;;  %v181_v15 = vld [vmem:[%s646_s3 + $0x20] sm:$0xff] }
   0x5   :  { %431 = vmatpush3.bf16.msra.mxu0 %v428_v3  ;;  %v182_v16 = vld [vmem:[%s646_s3 + $0x28] sm:$0xff]  ;;  %v23_v17 = vld [vmem:[%s645_s0 + $0x18] sm:$0xff]  ;;  %v24_v19 = vld [vmem:[%s645_s0 + $0x20] sm:$0xff] }
   0x6   :  { %433 = vmatprep.subr.bf16.mxu0 %v432_v6  ;;  %468 = vmatprep.subr.bf16.mxu1 %v436_v10  ;;  %v444_v18 = vpack.c.bf16 %v182_v16, %v181_v15  ;;  %v183_v20 = vld [vmem:[%s646_s3 + $0x30] sm:$0xff]  ;;  %v184_v21 = vld [vmem:[%s646_s3 + $0x38] sm:$0xff]  ;;  %v25_v22 = vld [vmem:[%s645_s0 + $0x28] sm:$0xff] }
   0x7   :  { %476 = vmatpush3.bf16.msra.mxu1 %v436_v10  ;;  %v448_v23 = vpack.c.bf16 %v184_v21, %v183_v20  ;;  %v26_v24 = vld [vmem:[%s645_s0 + $0x30] sm:$0xff]  ;;  %v185_v25 = vld [vmem:[%s646_s3 + $0x40] sm:$0xff]  ;;  %v186_v26 = vld [vmem:[%s646_s3 + $0x48] sm:$0xff] }
   0x8   :  { %469 = vmatprep.subr.bf16.mxu1 %v440_v12  ;;  %v27_v27 = vld [vmem:[%s645_s0 + $0x38] sm:$0xff]  ;;  %v452_v28 = vpack.c.bf16 %v186_v26, %v185_v25  ;;  %v187_v29 = vld [vmem:[%s646_s3 + $0x50] sm:$0xff]  ;;  %v189_v32 = vld [vmem:[%s646_s3 + $0x60] sm:$0xff] }
   0x9   :  { %435 = vmatpush3.bf16.msra.mxu0 %v432_v6  ;;  %v188_v30 = vld [vmem:[%s646_s3 + $0x58] sm:$0xff]  ;;  %v190_v33 = vld [vmem:[%s646_s3 + $0x68] sm:$0xff]  ;;  %v191_v35 = vld [vmem:[%s646_s3 + $0x70] sm:$0xff] }
   0xa   :  { %437 = vmatprep.subr.bf16.mxu0 %v436_v10  ;;  %v456_v31 = vpack.c.bf16 %v188_v30, %v187_v29  ;;  %v460_v34 = vpack.c.bf16 %v190_v33, %v189_v32  ;;  %v192_v36 = vld [vmem:[%s646_s3 + $0x78] sm:$0xff]  ;;  %v318_v38 = vld [vmem:[%s647_s2] ss:$0 sm:$0xff] }
   0xb   :  { %477 = vmatpush3.bf16.msra.mxu1 %v440_v12  ;;  %v464_v37 = vpack.c.bf16 %v192_v36, %v191_v35  ;;  %v327_v63 = vld [vmem:[%s648_s4] ss:$0 sm:$0xff] }
   0xc   :  { %373 = vmatmul.mubr.msk.f32.vlgmr.msra.gmra.mrb[0].mxu0 %vm39_vm0, %v21_v13  ;;  %470 = vmatprep.subr.bf16.mxu1 %v444_v18 }
   0xd   :  { %375 = vmatprep.mubr.msk.f32.mxu0 %vm39_vm0, %v22_v14  ;;  %439 = vmatpush3.bf16.msra.mxu0 %v436_v10 }
   0xe   :  { %441 = vmatprep.subr.bf16.mxu0 %v440_v12 }
   0xf   :  { %478 = vmatpush3.bf16.msra.mxu1 %v444_v18 }
  0x10   :  { %376 = vmatmul.mubr.msk.f32.gmra.mrb[2].mxu0 %vm39_vm0, %v23_v17  ;;  %471 = vmatprep.subr.bf16.mxu1 %v448_v23 }
  0x11   :  { %378 = vmatprep.mubr.msk.f32.mxu0 %vm39_vm0, %v24_v19  ;;  %443 = vmatpush3.bf16.msra.mxu0 %v440_v12 }
  0x12   :  { %445 = vmatprep.subr.bf16.mxu0 %v444_v18 }
  0x13   :  { %479 = vmatpush3.bf16.msra.mxu1 %v448_v23 }
  0x14   :  { %379 = vmatmul.mubr.msk.f32.gmra.mrb[4].mxu0 %vm39_vm0, %v25_v22  ;;  %472 = vmatprep.subr.bf16.mxu1 %v452_v28 }
  0x15   :  { %381 = vmatprep.mubr.msk.f32.mxu0 %vm39_vm0, %v26_v24  ;;  %447 = vmatpush3.bf16.msra.mxu0 %v444_v18 }
  0x16   :  { %449 = vmatprep.subr.bf16.mxu0 %v448_v23 }
  0x17   :  { %480 = vmatpush3.bf16.msra.mxu1 %v452_v28 }
  0x18   :  { %382 = vmatmul.mubr.msk.f32.gmra.mrb[6].mxu0 %vm39_vm0, %v27_v27  ;;  %473 = vmatprep.subr.bf16.mxu1 %v456_v31 }
  0x19   :  { %451 = vmatpush3.bf16.msra.mxu0 %v448_v23 }
  0x1a   :  { %453 = vmatprep.subr.bf16.mxu0 %v452_v28 }
  0x1b   :  { %481 = vmatpush3.bf16.msra.mxu1 %v456_v31 }
  0x1c   :  { %474 = vmatprep.subr.bf16.mxu1 %v460_v34 }
  0x1d   :  { %455 = vmatpush3.bf16.msra.mxu0 %v452_v28 }
  0x1e   :  { %457 = vmatprep.subr.bf16.mxu0 %v456_v31 }
  0x1f   :  { %482 = vmatpush3.bf16.msra.mxu1 %v460_v34 }
  0x20   :  { %475 = vmatprep.subr.bf16.mxu1 %v464_v37 }
  0x21   :  { %459 = vmatpush3.bf16.msra.mxu0 %v456_v31 }
  0x22   :  { %461 = vmatprep.subr.bf16.mxu0 %v460_v34 }
  0x23   :  { %483 = vmatpush3.bf16.msra.mxu1 %v464_v37 }
  0x25   :  { %463 = vmatpush3.bf16.msra.mxu0 %v460_v34 }
  0x26   :  { %465 = vmatprep.subr.bf16.mxu0 %v464_v37 }
  0x29   :  { %467 = vmatpush3.bf16.msra.mxu0 %v464_v37 }
  0xdf   :  { %v374_v39 = vpop.f32.mrb[0].mxu0 }
  0xe0   :  { %v136_v40 = vadd.f32 %v374_v39, %v318_v38  ;;  %v130_v41 = vpop.f32.mrb[1].mxu0 }
  0xe1   :  { %v131_v42 = vadd.f32 %v318_v38, %v130_v41 }
  0xe2   :  { %v170_v45 = vmax.f32 %v136_v40, 0.0 }
  0xe3   :  { %v169_v43 = vmax.f32 %v131_v42, 0.0  ;;  %v377_v44 = vpop.f32.mrb[2].mxu0 }
  0xe4   :  { %v146_v46 = vadd.f32 %v377_v44, %v318_v38  ;;  %v140_v47 = vpop.f32.mrb[3].mxu0 }
  0xe5   :  { %416 = vmatprep.mubr.f32.mxu0 %v169_v43  ;;  %v141_v48 = vadd.f32 %v318_v38, %v140_v47 }
  0xe6   :  { %417 = vmatmul.mubr.f32.vlgmr.msra.gmra.mrb[8].mxu0 %v170_v45  ;;  %v172_v51 = vmax.f32 %v146_v46, 0.0 }
  0xe7   :  { %v380_v49 = vpop.f32.mrb[4].mxu0  ;;  %v171_v50 = vmax.f32 %v141_v48, 0.0 }
  0xe8   :  { %v156_v52 = vadd.f32 %v380_v49, %v318_v38  ;;  %v150_v53 = vpop.f32.mrb[5].mxu0 }
  0xe9   :  { %v151_v54 = vadd.f32 %v318_v38, %v150_v53  ;;  %419 = vmatprep.mubr.f32.mxu1 %v171_v50 }
  0xea   :  { %420 = vmatmul.mubr.f32.vlgmr.msra.gmra.mrb[0].mxu1 %v172_v51  ;;  %v174_v57 = vmax.f32 %v156_v52, 0.0 }
  0xeb   :  { %v173_v55 = vmax.f32 %v151_v54, 0.0  ;;  %v383_v56 = vpop.f32.mrb[6].mxu0 }
  0xec   :  { %v166_v58 = vadd.f32 %v383_v56, %v318_v38  ;;  %v160_v59 = vpop.f32.mrb[7].mxu0 }
  0xed   :  { %v161_v60 = vadd.f32 %v318_v38, %v160_v59  ;;  %422 = vmatprep.mubr.f32.mxu1 %v173_v55 }
  0xee   :  { %423 = vmatmul.mubr.f32.gmra.mrb[2].mxu1 %v174_v57  ;;  %v176_v62 = vmax.f32 %v166_v58, 0.0 }
  0xef   :  { %v175_v61 = vmax.f32 %v161_v60, 0.0 }
  0xf1   :  { %425 = vmatprep.mubr.f32.mxu1 %v175_v61 }
  0xf2   :  { %426 = vmatmul.mubr.f32.gmra.mrb[4].mxu1 %v176_v62 }
 0x1b9   :  { %v418_v0 = vpop.f32.mrb[8].mxu0 }
 0x1ba   :  { %v272_v1 = vadd.f32 %v418_v0, %v327_v63  ;;  %v266_v2 = vpop.f32.mrb[9].mxu0 }
 0x1bb   :  { %v267_v3 = vadd.f32 %v327_v63, %v266_v2 }
 0x1bc   :  { %307 = vst.msk [vmem:[%s649_s5 + $0x8] sm:$0xff] %vm305_vm1, %v272_v1 }
 0x1bd   :  { %306 = vst.msk [vmem:[%s649_s5] sm:$0xff] %vm305_vm1, %v267_v3  ;;  %v421_v4 = vpop.f32.mrb[0].mxu1 }
 0x1be   :  { %v282_v5 = vadd.f32 %v421_v4, %v327_v63  ;;  %v276_v6 = vpop.f32.mrb[1].mxu1 }
 0x1bf   :  { %v277_v7 = vadd.f32 %v327_v63, %v276_v6 }
 0x1c0   :  { %309 = vst.msk [vmem:[%s649_s5 + $0x18] sm:$0xff] %vm305_vm1, %v282_v5 }
 0x1c1   :  { %308 = vst.msk [vmem:[%s649_s5 + $0x10] sm:$0xff] %vm305_vm1, %v277_v7  ;;  %v424_v8 = vpop.f32.mrb[2].mxu1 }
 0x1c2   :  { %v292_v9 = vadd.f32 %v424_v8, %v327_v63  ;;  %v286_v10 = vpop.f32.mrb[3].mxu1 }
 0x1c3   :  { %v287_v11 = vadd.f32 %v327_v63, %v286_v10 }
 0x1c4   :  { %311 = vst.msk [vmem:[%s649_s5 + $0x28] sm:$0xff] %vm305_vm1, %v292_v9 }
 0x1c5   :  { %310 = vst.msk [vmem:[%s649_s5 + $0x20] sm:$0xff] %vm305_vm1, %v287_v11  ;;  %v427_v12 = vpop.f32.mrb[4].mxu1 }
 0x1c6   :  { %v302_v13 = vadd.f32 %v427_v12, %v327_v63  ;;  %v296_v14 = vpop.f32.mrb[5].mxu1 }
 0x1c7   :  { %v297_v15 = vadd.f32 %v327_v63, %v296_v14 }
 0x1c8   :  { %313 = vst.msk [vmem:[%s649_s5 + $0x38] sm:$0xff] %vm305_vm1, %v302_v13 }
 0x1c9   :  { %312 = vst.msk [vmem:[%s649_s5 + $0x30] sm:$0xff] %vm305_vm1, %v297_v15 }

</bundles_post_ra>
